<compile_context>
chip_gen: v5e
topology: v5e:2x2
jax: 0.10.0
libtpu: 0.0.40
codegen_flags: <defaults>
</compile_context>

<pallas_src>
import math

import jax
import jax.numpy as jnp
from jax import lax
from jax.experimental import pallas as pl
from jax.experimental.pallas import tpu as pltpu

LN_EPS = 1e-5
ROPE_THETA = 10000.0
NEG = -1e30                       # finite mask sentinel (robust vs -inf after tiling)
LOG2E = 1.4426950408889634
VMEM_LIMIT = 64 * 1024 * 1024     # explicit scoped-VMEM budget (fits v7x's 64 MiB)


def _layernorm(x, gamma, beta):
    mu = jnp.mean(x, axis=-1, keepdims=True)
    var = jnp.mean((x - mu) ** 2, axis=-1, keepdims=True)   # biased var (PyTorch LayerNorm)
    return (x - mu) / jnp.sqrt(var + LN_EPS) * gamma + beta


def _gelu_tanh(x):
    return 0.5 * x * (1.0 + jnp.tanh(jnp.sqrt(2.0 / jnp.pi) * (x + 0.044715 * x ** 3)))


def _seq_tile(T):
    for c in (256, 128):
        if T % c == 0:
            return c
    return T


def _col_tile(N):
    for c in (2048, 1024, 512, 256, 128):
        if N % c == 0:
            return c
    return N


def _resident(arr):
    # Grid-invariant (constant block index) -> fetched once per pallas_call.
    # TODO(synk): single-buffer these (pl.Buffered(1)) and/or tile wqkv's N=3D axis
    # for very large emb_dim; left default-buffered for lowering robustness.
    nd = arr.ndim
    return pl.BlockSpec(arr.shape, lambda *_: (0,) * nd)


def _cparams(dims):
    return pltpu.CompilerParams(dimension_semantics=dims,
                                vmem_limit_bytes=VMEM_LIMIT)


# ---------------------------------------------------------------------------
# Kernel 1: LayerNorm1 + fused QKV projection + RoPE, per sequence tile.
# wqkv columns are pre-permuted host-side to
#   [q first-halves | q second-halves | k first-halves | k second-halves | v]
# (head-major inside each group) with 1/sqrt(Dh)*log2(e) folded into the q columns,
# so RoPE is applied with full-width vector math (no per-head transcendentals).
# ---------------------------------------------------------------------------
def qkv_rope_kernel(x_ref, cos_ref, sin_ref, g1_ref, b1_ref, wqkv_ref,
                    q_ref, k_ref, v_ref):
    H = q_ref.shape[1]
    Dh = q_ref.shape[3]
    Dh2 = Dh // 2
    D = x_ref.shape[2]
    HD2 = H * Dh2

    xn = _layernorm(x_ref[0].astype(jnp.float32), g1_ref[0], b1_ref[0])
    qkv = jnp.dot(xn.astype(wqkv_ref.dtype), wqkv_ref[...],
                  preferred_element_type=jnp.float32)            # [TT, 3D] f32

    cos = cos_ref[0]                                             # [TT, H*Dh2] f32
    sin = sin_ref[0]
    qa_in = qkv[:, 0:HD2]          # all heads' q first halves
    qb_in = qkv[:, HD2:D]          # all heads' q second halves
    ka_in = qkv[:, D:D + HD2]
    kb_in = qkv[:, D + HD2:2 * D]
    vv = qkv[:, 2 * D:]

    # rotate-half RoPE, vectorized across every head at once
    qa = qa_in * cos - qb_in * sin
    qb = qb_in * cos + qa_in * sin
    ka = ka_in * cos - kb_in * sin
    kb = kb_in * cos + ka_in * sin

    # TODO(synk): the per-head packing loop below is kept for lowering robustness
    # (lane-splitting reshapes / pltpu.roll at Dh < 128 hit Mosaic layout limits);
    # at Dh=128 the [B,H,T,Dh] output is already lane-dense.
    for h in range(H):
        s2 = slice(h * Dh2, (h + 1) * Dh2)
        q_ref[0, h] = jnp.concatenate([qa[:, s2], qb[:, s2]], -1).astype(q_ref.dtype)
        k_ref[0, h] = jnp.concatenate([ka[:, s2], kb[:, s2]], -1).astype(k_ref.dtype)
        v_ref[0, h] = vv[:, h * Dh:(h + 1) * Dh].astype(v_ref.dtype)


def run_qkv_rope(x, cos_rep, sin_rep, p, num_heads):
    B, T, D = x.shape
    Dh = D // num_heads
    TT = _seq_tile(T)
    NT = T // TT
    HD2 = num_heads * (Dh // 2)
    qspec = pl.BlockSpec((1, num_heads, TT, Dh), lambda b, ti: (b, 0, ti, 0))
    out_sd = jax.ShapeDtypeStruct((B, num_heads, T, Dh), jnp.bfloat16)
    return pl.pallas_call(
        qkv_rope_kernel,
        out_shape=(out_sd, out_sd, out_sd),
        grid_spec=pltpu.PrefetchScalarGridSpec(
            num_scalar_prefetch=0,
            grid=(B, NT),
            in_specs=[pl.BlockSpec((1, TT, D), lambda b, ti: (b, ti, 0)),
                      pl.BlockSpec((1, TT, HD2), lambda b, ti: (b, ti, 0)),
                      pl.BlockSpec((1, TT, HD2), lambda b, ti: (b, ti, 0)),
                      _resident(p["ln1_g"]),
                      _resident(p["ln1_b"]),
                      _resident(p["wqkv"])],
            out_specs=(qspec, qspec, qspec),
        ),
        compiler_params=_cparams(("parallel", "parallel")),
    )(x, cos_rep, sin_rep, p["ln1_g"], p["ln1_b"], p["wqkv"])


# ---------------------------------------------------------------------------
# Kernel 2: flash attention (heads batched via einsum), exp2 online softmax.
# grid = (B, NQ, NK); KV axis is the sequential reduction axis.  k/v/mask index
# maps clamp the KV block index so fully-masked tiles are never re-DMA'd.
# Output is the attention context in lane-dense [B, T, D] (heads packed).
# ---------------------------------------------------------------------------
def attn_kernel(q_ref, k_ref, v_ref, msk_ref, o_ref, m_sc, l_sc, acc_sc):
    H = q_ref.shape[1]
    TQ = q_ref.shape[2]
    Dh = q_ref.shape[3]
    TK = k_ref.shape[2]
    qi = pl.program_id(1)
    ki = pl.program_id(2)

    @pl.when(ki == 0)
    def _init():
        m_sc[...] = jnp.full_like(m_sc, NEG)
        l_sc[...] = jnp.zeros_like(l_sc)
        acc_sc[...] = jnp.zeros_like(acc_sc)

    @pl.when(ki <= qi)              # fully-causally-masked KV tiles: compute skipped
    def _step():
        q = q_ref[0]                                           # [H,TQ,Dh] bf16
        k = k_ref[0]
        v = v_ref[0]
        # q already carries 1/sqrt(Dh)*log2(e): scores live in log2 space -> exp2.
        s = jnp.einsum("hqd,hkd->hqk", q, k,
                       preferred_element_type=jnp.float32)     # [H,TQ,TK] f32

        row = lax.broadcasted_iota(jnp.int32, (TQ, TK), 0) + qi * TQ
        col = lax.broadcasted_iota(jnp.int32, (TQ, TK), 1) + ki * TK
        keep = (col <= row) & (msk_ref[0] > 0)                 # causal AND key padding
        s = jnp.where(keep[None, :, :], s, NEG)

        m_prev = m_sc[...]                                     # [H,TQ,1]
        m_new = jnp.maximum(m_prev, jnp.max(s, axis=-1, keepdims=True))
        alpha = jnp.exp2(m_prev - m_new)
        pmat = jnp.exp2(s - m_new)                             # [H,TQ,TK]
        l_sc[...] = alpha * l_sc[...] + jnp.sum(pmat, axis=-1, keepdims=True)
        acc_sc[...] = alpha * acc_sc[...] + jnp.einsum(
            "hqk,hkd->hqd", pmat.astype(v.dtype), v,
            preferred_element_type=jnp.float32)
        m_sc[...] = m_new

    @pl.when(ki == qi)              # last un-skipped KV tile -> finalize this q tile
    def _finalize():
        # approx reciprocal runs on the EUP (~1e-3 rel err, fine for inference)
        ctx = acc_sc[...] * pl.reciprocal(l_sc[...], approx=True)   # [H,TQ,Dh]
        for h in range(H):          # pack heads into lane-dense [TQ, D] (no concat copy)
            o_ref[0, :, h * Dh:(h + 1) * Dh] = ctx[h].astype(o_ref.dtype)


def run_attn(q, k, v, key_mask):
    B, H, T, Dh = q.shape
    D = H * Dh
    TQ = _seq_tile(T)
    NQ = T // TQ

    def kv_idx(b, qi, ki):          # clamp: masked tiles reuse the resident block
        return (b, 0, jnp.minimum(ki, qi), 0)

    def msk_idx(b, qi, ki):
        return (b, 0, jnp.minimum(ki, qi))

    return pl.pallas_call(
        attn_kernel,
        out_shape=jax.ShapeDtypeStruct((B, T, D), jnp.bfloat16),
        grid_spec=pltpu.PrefetchScalarGridSpec(
            num_scalar_prefetch=0,
            grid=(B, NQ, NQ),
            in_specs=[pl.BlockSpec((1, H, TQ, Dh), lambda b, qi, ki: (b, 0, qi, 0)),
                      pl.BlockSpec((1, H, TQ, Dh), kv_idx),
                      pl.BlockSpec((1, H, TQ, Dh), kv_idx),
                      pl.BlockSpec((1, 1, TQ), msk_idx)],
            out_specs=pl.BlockSpec((1, TQ, D), lambda b, qi, ki: (b, qi, 0)),
            scratch_shapes=[pltpu.VMEM((H, TQ, 1), jnp.float32),    # m
                            pltpu.VMEM((H, TQ, 1), jnp.float32),    # l
                            pltpu.VMEM((H, TQ, Dh), jnp.float32)],  # acc
        ),
        compiler_params=_cparams(("parallel", "parallel", "arbitrary")),
    )(q, k, v, key_mask)


# ---------------------------------------------------------------------------
# Kernel 3: Wo projection + residual + LayerNorm2 + FFN (+ residual), with the
# FFN hidden axis (4*D) tiled over the grid -> w1/w2 never fully VMEM-resident.
# grid = (B, NT, NF); NF is the sequential reduction axis with a VMEM accumulator.
# ---------------------------------------------------------------------------
def proj_ffn_kernel(xres_ref, ctx_ref, wo_ref, bo_ref, ln2g_ref, ln2b_ref,
                    w1_ref, b1_ref, w2_ref, b2_ref, o_ref,
                    x1_sc, xn2_sc, acc_sc):
    f = pl.program_id(2)

    @pl.when(f == 0)
    def _proj():
        attn = jnp.dot(ctx_ref[0], wo_ref[...],
                       preferred_element_type=jnp.float32) + bo_ref[0]
        x1 = xres_ref[0].astype(jnp.float32) + attn            # residual 1
        x1_sc[...] = x1
        xn2_sc[...] = _layernorm(x1, ln2g_ref[0], ln2b_ref[0]).astype(xn2_sc.dtype)
        acc_sc[...] = jnp.zeros_like(acc_sc)

    h1 = jnp.dot(xn2_sc[...], w1_ref[...],
                 preferred_element_type=jnp.float32) + b1_ref[0]   # [TT, TF]
    h1 = _gelu_tanh(h1)
    acc_sc[...] += jnp.dot(h1.astype(w2_ref.dtype), w2_ref[...],
                           preferred_element_type=jnp.float32)     # [TT, D]

    @pl.when(f == pl.num_programs(2) - 1)
    def _fin():
        o_ref[0] = (x1_sc[...] + acc_sc[...] + b2_ref[0]).astype(o_ref.dtype)


def run_proj_ffn(x, ctx, p):
    B, T, D = x.shape
    F = p["w1"].shape[1]
    TT = _seq_tile(T)
    NT = T // TT
    TF = _col_tile(F)
    NF = F // TF
    return pl.pallas_call(
        proj_ffn_kernel,
        out_shape=jax.ShapeDtypeStruct((B, T, D), jnp.bfloat16),
        grid_spec=pltpu.PrefetchScalarGridSpec(
            num_scalar_prefetch=0,
            grid=(B, NT, NF),
            in_specs=[pl.BlockSpec((1, TT, D), lambda b, ti, f: (b, ti, 0)),   # residual x
                      pl.BlockSpec((1, TT, D), lambda b, ti, f: (b, ti, 0)),   # attn ctx
                      _resident(p["wo"]),
                      _resident(p["bo"]),
                      _resident(p["ln2_g"]),
                      _resident(p["ln2_b"]),
                      pl.BlockSpec((D, TF), lambda b, ti, f: (0, f)),          # w1 tile
                      pl.BlockSpec((1, TF), lambda b, ti, f: (0, f)),          # b1 tile
                      pl.BlockSpec((TF, D), lambda b, ti, f: (f, 0)),          # w2 tile
                      _resident(p["b2"])],
            out_specs=pl.BlockSpec((1, TT, D), lambda b, ti, f: (b, ti, 0)),
            scratch_shapes=[pltpu.VMEM((TT, D), jnp.float32),    # post-attn residual
                            pltpu.VMEM((TT, D), jnp.bfloat16),   # LN2'd + cast activation
                            pltpu.VMEM((TT, D), jnp.float32)],   # FFN accumulator
        ),
        compiler_params=_cparams(("parallel", "parallel", "arbitrary")),
    )(x, ctx, p["wo"], p["bo"], p["ln2_g"], p["ln2_b"],
      p["w1"], p["b1"], p["w2"], p["b2"])


# ---------------------------------------------------------------------------
# Kernel 4: final LayerNorm (computed once, bf16 out for the LM head).
# ---------------------------------------------------------------------------
def final_ln_kernel(x_ref, g_ref, b_ref, o_ref):
    o_ref[0] = _layernorm(x_ref[0].astype(jnp.float32),
                          g_ref[0], b_ref[0]).astype(o_ref.dtype)


def run_final_ln(x, gamma, beta):
    B, T, D = x.shape
    TT = _seq_tile(T)
    NT = T // TT
    return pl.pallas_call(
        final_ln_kernel,
        out_shape=jax.ShapeDtypeStruct((B, T, D), jnp.bfloat16),
        grid_spec=pltpu.PrefetchScalarGridSpec(
            num_scalar_prefetch=0,
            grid=(B, NT),
            in_specs=[pl.BlockSpec((1, TT, D), lambda b, ti: (b, ti, 0)),
                      _resident(gamma), _resident(beta)],
            out_specs=pl.BlockSpec((1, TT, D), lambda b, ti: (b, ti, 0)),
        ),
        compiler_params=_cparams(("parallel", "parallel")),
    )(x, gamma, beta)


# ---------------------------------------------------------------------------
# Kernel 5: LM head matmul; vocab axis OUTERMOST so each [D,TV] weight tile is
# fetched from HBM exactly once; logits emitted in bf16 (halves the writeback).
# ---------------------------------------------------------------------------
def lm_head_kernel(xn_ref, w_ref, bias_ref, o_ref):
    o_ref[0] = (jnp.dot(xn_ref[0], w_ref[...],
                        preferred_element_type=jnp.float32)
                + bias_ref[0]).astype(o_ref.dtype)


def run_lm_head(xn, w_out, out_b):
    B, T, D = xn.shape
    V = w_out.shape[1]
    TT = _seq_tile(T)
    NT = T // TT
    TV = _col_tile(V)
    NV = V // TV
    return pl.pallas_call(
        lm_head_kernel,
        out_shape=jax.ShapeDtypeStruct((B, T, V), jnp.bfloat16),
        grid_spec=pltpu.PrefetchScalarGridSpec(
            num_scalar_prefetch=0,
            grid=(NV, B, NT),
            in_specs=[pl.BlockSpec((1, TT, D), lambda vi, b, ti: (b, ti, 0)),
                      pl.BlockSpec((D, TV), lambda vi, b, ti: (0, vi)),
                      pl.BlockSpec((1, TV), lambda vi, b, ti: (0, vi))],
            out_specs=pl.BlockSpec((1, TT, TV), lambda vi, b, ti: (b, ti, vi)),
        ),
        compiler_params=_cparams(("parallel", "parallel", "parallel")),
    )(xn, w_out, out_b)


# ---------------------------------------------------------------------------
# Forward pass (matches GPTModel_RoPE.forward((in_idx, attn_mask, positions)))
# ---------------------------------------------------------------------------
def gpt_forward(in_idx, attn_mask, positions, params, cfg):
    B, T = in_idx.shape
    D = cfg["emb_dim"]
    H = cfg["n_heads"]
    Dh = D // H
    Dh2 = Dh // 2

    # glue: embedding gathers + abs-pos add (plain JAX), dropout = identity (eval)
    x = params["tok_emb"][in_idx]                                  # [B,T,D] f32
    if not cfg.get("no_pos_emb", False):
        x = x + params["pos_emb"][:T][None, :, :]
    x = x.astype(jnp.bfloat16)                                     # bf16 residual stream

    key_mask = attn_mask.astype(jnp.float32).reshape(B, 1, T)      # 1 = attend, 0 = pad

    # RoPE cos/sin per token, computed once and reused by every layer; tiled across
    # heads to match the half-grouped wqkv column layout (no in-kernel trig).
    inv_freq = ROPE_THETA ** (-jnp.arange(Dh2, dtype=jnp.float32) * 2.0 / Dh)
    ang = positions.astype(jnp.float32)[..., None] * inv_freq[None, None, :]  # [B,T,Dh2]
    cos_rep = jnp.tile(jnp.cos(ang), (1, 1, H))                    # [B,T,H*Dh2] f32
    sin_rep = jnp.tile(jnp.sin(ang), (1, 1, H))

    for layer in params["blocks"]:
        q, k, v = run_qkv_rope(x, cos_rep, sin_rep, layer, H)
        ctx = run_attn(q, k, v, key_mask)
        x = run_proj_ffn(x, ctx, layer)

    xn = run_final_ln(x, params["lnf_g"], params["lnf_b"])
    return run_lm_head(xn, params["w_out"], params["out_b"])


# ---------------------------------------------------------------------------
# Deterministic synthetic parameter init (shapes from the module's __init__).
# Matmul weights stored [in, out] and pre-cast to bf16 (f32 accumulation in-kernel).
# ---------------------------------------------------------------------------
def _pack_wqkv(wq, wk, wv, num_heads):
    """Fuse Wq|Wk|Wv [D,D] each into one [D,3D] bf16 weight whose q/k columns are
    permuted to [all heads' first halves | all heads' second halves] (head-major
    inside each group) and whose q columns carry 1/sqrt(Dh)*log2(e)."""
    D = wq.shape[0]
    Dh = D // num_heads
    Dh2 = Dh // 2

    def perm(w):
        return jnp.transpose(w.reshape(D, num_heads, 2, Dh2), (0, 2, 1, 3)).reshape(D, D)

    qscale = (1.0 / math.sqrt(Dh)) * LOG2E
    return jnp.concatenate([perm(wq) * qscale, perm(wk), wv], axis=1).astype(jnp.bfloat16)


def init_params(key, cfg):
    D, V, C, L, H = (cfg["emb_dim"], cfg["vocab_size"], cfg["context_length"],
                     cfg["n_layers"], cfg["n_heads"])

    def nrm(k, shape, scale=0.02, dtype=jnp.float32):
        return (scale * jax.random.normal(k, shape)).astype(dtype)

    keys = jax.random.split(key, 3 + L)
    params = {
        "tok_emb": nrm(keys[0], (V, D)),
        "pos_emb": nrm(keys[1], (C, D)),
        "lnf_g": jnp.ones((1, D), jnp.float32),
        "lnf_b": jnp.zeros((1, D), jnp.float32),
        "blocks": [],
    }
    for i in range(L):
        ks = jax.random.split(keys[3 + i], 6)
        wq = nrm(ks[0], (D, D))
        wk = nrm(ks[1], (D, D))
        wv = nrm(ks[2], (D, D))
        params["blocks"].append({
            "ln1_g": jnp.ones((1, D), jnp.float32),
            "ln1_b": jnp.zeros((1, D), jnp.float32),
            "ln2_g": jnp.ones((1, D), jnp.float32),
            "ln2_b": jnp.zeros((1, D), jnp.float32),
            "wqkv": _pack_wqkv(wq, wk, wv, H),          # qkv_bias=False assumed
            "wo": nrm(ks[3], (D, D), dtype=jnp.bfloat16),
            "bo": jnp.zeros((1, D), jnp.float32),
            "w1": nrm(ks[4], (D, 4 * D), dtype=jnp.bfloat16),
            "b1": jnp.zeros((1, 4 * D), jnp.float32),
            "w2": nrm(ks[5], (4 * D, D), dtype=jnp.bfloat16),
            "b2": jnp.zeros((1, D), jnp.float32),
        })
    if cfg.get("weight_tying", False):
        params["w_out"] = params["tok_emb"].T.astype(jnp.bfloat16)   # [D, V]
        params["out_b"] = jnp.zeros((1, V), jnp.float32)             # tied head zero-init bias
    else:
        params["w_out"] = nrm(keys[2], (D, V), dtype=jnp.bfloat16)   # [in, out]
        params["out_b"] = jnp.zeros((1, V), jnp.float32)             # no bias (zeros)
    return params


if __name__ == "__main__":
    cfg = {
        "vocab_size": 64,
        "context_length": 16,
        "emb_dim": 32,
        "n_heads": 4,
        "n_layers": 2,
        "drop_rate": 0.0,        # dropout is identity
        "qkv_bias": False,
        "no_pos_emb": False,
        "weight_tying": False,
    }
    key = jax.random.PRNGKey(0)
    k_param, k_idx = jax.random.split(key)
    params = init_params(k_param, cfg)

    B, T = 2, 8
    in_idx = jax.random.randint(k_idx, (B, T), 0, cfg["vocab_size"], dtype=jnp.int32)
    attn_mask = jnp.ones((B, T), jnp.int32)                          # no padding
    positions = jnp.broadcast_to(jnp.arange(T, dtype=jnp.int32)[None, :], (B, T))

    logits = gpt_forward(in_idx, attn_mask, positions, params, cfg)
    logits = jax.block_until_ready(logits)
    assert logits.shape == (B, T, cfg["vocab_size"])
    assert bool(jnp.all(jnp.isfinite(logits.astype(jnp.float32))))
    print("KERNEL_OK")
</pallas_src>

<mosaic_0001>
module attributes {stable_mosaic.version = 11 : i64} {
  func.func @qkv_rope_kernel(%arg0: i32, %arg1: i32, %arg2: memref<1x8x32xbf16, #tpu.memory_space<vmem>>, %arg3: memref<1x8x16xf32, #tpu.memory_space<vmem>>, %arg4: memref<1x8x16xf32, #tpu.memory_space<vmem>>, %arg5: memref<1x32xf32, #tpu.memory_space<vmem>>, %arg6: memref<1x32xf32, #tpu.memory_space<vmem>>, %arg7: memref<32x96xbf16, #tpu.memory_space<vmem>>, %arg8: memref<1x4x8x8xbf16, #tpu.memory_space<vmem>>, %arg9: memref<1x4x8x8xbf16, #tpu.memory_space<vmem>>, %arg10: memref<1x4x8x8xbf16, #tpu.memory_space<vmem>>) attributes {dimension_semantics = [#tpu.dimension_semantics<parallel>, #tpu.dimension_semantics<parallel>], iteration_bounds = array<i64: 2, 1>, scalar_prefetch = 0 : i64, scratch_operands = 0 : i64, tpu.core_type = #tpu.core_type<tc>, window_params = [{transform_indices = @transform_0, window_bounds = array<i64: 1, 8, 32>}, {transform_indices = @transform_1, window_bounds = array<i64: 1, 8, 16>}, {transform_indices = @transform_2, window_bounds = array<i64: 1, 8, 16>}, {pipeline_mode = #tpu.pipeline_mode<synchronous>, transform_indices = @transform_3, window_bounds = array<i64: 1, 32>}, {pipeline_mode = #tpu.pipeline_mode<synchronous>, transform_indices = @transform_4, window_bounds = array<i64: 1, 32>}, {pipeline_mode = #tpu.pipeline_mode<synchronous>, transform_indices = @transform_5, window_bounds = array<i64: 32, 96>}, {transform_indices = @transform_6, window_bounds = array<i64: 1, 4, 8, 8>}, {transform_indices = @transform_7, window_bounds = array<i64: 1, 4, 8, 8>}, {transform_indices = @transform_8, window_bounds = array<i64: 1, 4, 8, 8>}]} {
    %c0 = arith.constant 0 : index
    %c0_0 = arith.constant 0 : index
    %c0_1 = arith.constant 0 : index
    %0 = vector.load %arg2[%c0, %c0_0, %c0_1] : memref<1x8x32xbf16, #tpu.memory_space<vmem>>, vector<1x8x32xbf16>
    %1 = vector.shape_cast %0 : vector<1x8x32xbf16> to vector<8x32xbf16>
    %2 = arith.extf %1 : vector<8x32xbf16> to vector<8x32xf32>
    %c0_2 = arith.constant 0 : index
    %c0_3 = arith.constant 0 : index
    %3 = vector.load %arg5[%c0_2, %c0_3] : memref<1x32xf32, #tpu.memory_space<vmem>>, vector<1x32xf32>
    %4 = vector.shape_cast %3 : vector<1x32xf32> to vector<32xf32>
    %c0_4 = arith.constant 0 : index
    %c0_5 = arith.constant 0 : index
    %5 = vector.load %arg6[%c0_4, %c0_5] : memref<1x32xf32, #tpu.memory_space<vmem>>, vector<1x32xf32>
    %6 = vector.shape_cast %5 : vector<1x32xf32> to vector<32xf32>
    %cst = arith.constant dense<0.000000e+00> : vector<8xf32>
    %7 = vector.multi_reduction <add>, %2, %cst [1] : vector<8x32xf32> to vector<8xf32>
    %8 = vector.shape_cast %7 : vector<8xf32> to vector<8x1xf32>
    %cst_6 = arith.constant 3.200000e+01 : f32
    %9 = vector.broadcast %cst_6 : f32 to vector<8x1xf32>
    %10 = arith.divf %8, %9 : vector<8x1xf32>
    %11 = vector.broadcast %10 : vector<8x1xf32> to vector<8x32xf32>
    %12 = arith.subf %2, %11 : vector<8x32xf32>
    %13 = arith.mulf %12, %12 : vector<8x32xf32>
    %cst_7 = arith.constant dense<0.000000e+00> : vector<8xf32>
    %14 = vector.multi_reduction <add>, %13, %cst_7 [1] : vector<8x32xf32> to vector<8xf32>
    %15 = vector.shape_cast %14 : vector<8xf32> to vector<8x1xf32>
    %cst_8 = arith.constant 3.200000e+01 : f32
    %16 = vector.broadcast %cst_8 : f32 to vector<8x1xf32>
    %17 = arith.divf %15, %16 : vector<8x1xf32>
    %18 = vector.broadcast %10 : vector<8x1xf32> to vector<8x32xf32>
    %19 = arith.subf %2, %18 : vector<8x32xf32>
    %cst_9 = arith.constant 9.99999974E-6 : f32
    %20 = vector.broadcast %cst_9 : f32 to vector<8x1xf32>
    %21 = arith.addf %17, %20 : vector<8x1xf32>
    %22 = math.sqrt %21 : vector<8x1xf32>
    %23 = vector.broadcast %22 : vector<8x1xf32> to vector<8x32xf32>
    %24 = arith.divf %19, %23 : vector<8x32xf32>
    %25 = vector.shape_cast %4 : vector<32xf32> to vector<1x32xf32>
    %26 = vector.broadcast %25 : vector<1x32xf32> to vector<8x32xf32>
    %27 = arith.mulf %24, %26 : vector<8x32xf32>
    %28 = vector.shape_cast %6 : vector<32xf32> to vector<1x32xf32>
    %29 = vector.broadcast %28 : vector<1x32xf32> to vector<8x32xf32>
    %30 = arith.addf %27, %29 : vector<8x32xf32>
    %31 = arith.truncf %30 : vector<8x32xf32> to vector<8x32xbf16>
    %c0_10 = arith.constant 0 : index
    %c0_11 = arith.constant 0 : index
    %32 = vector.load %arg7[%c0_10, %c0_11] : memref<32x96xbf16, #tpu.memory_space<vmem>>, vector<32x96xbf16>
    %cst_12 = arith.constant dense<0.000000e+00> : vector<8x96xf32>
    %33 = tpu.matmul %31, %32, %cst_12 {dimension_numbers = #tpu.dot_dimension_numbers<[1], [0], [0], [1], [0, 0, 1, 1], [], []>} : vector<8x32xbf16>, vector<32x96xbf16>, vector<8x96xf32> -> vector<8x96xf32>
    %c0_13 = arith.constant 0 : index
    %c0_14 = arith.constant 0 : index
    %c0_15 = arith.constant 0 : index
    %34 = vector.load %arg3[%c0_13, %c0_14, %c0_15] : memref<1x8x16xf32, #tpu.memory_space<vmem>>, vector<1x8x16xf32>
    %35 = vector.shape_cast %34 : vector<1x8x16xf32> to vector<8x16xf32>
    %c0_16 = arith.constant 0 : index
    %c0_17 = arith.constant 0 : index
    %c0_18 = arith.constant 0 : index
    %36 = vector.load %arg4[%c0_16, %c0_17, %c0_18] : memref<1x8x16xf32, #tpu.memory_space<vmem>>, vector<1x8x16xf32>
    %37 = vector.shape_cast %36 : vector<1x8x16xf32> to vector<8x16xf32>
    %38 = vector.extract_strided_slice %33 {offsets = [0, 0], sizes = [8, 16], strides = [1, 1]} : vector<8x96xf32> to vector<8x16xf32>
    %39 = vector.extract_strided_slice %33 {offsets = [0, 16], sizes = [8, 16], strides = [1, 1]} : vector<8x96xf32> to vector<8x16xf32>
    %40 = vector.extract_strided_slice %33 {offsets = [0, 32], sizes = [8, 16], strides = [1, 1]} : vector<8x96xf32> to vector<8x16xf32>
    %41 = vector.extract_strided_slice %33 {offsets = [0, 48], sizes = [8, 16], strides = [1, 1]} : vector<8x96xf32> to vector<8x16xf32>
    %42 = vector.extract_strided_slice %33 {offsets = [0, 64], sizes = [8, 32], strides = [1, 1]} : vector<8x96xf32> to vector<8x32xf32>
    %43 = arith.mulf %38, %35 : vector<8x16xf32>
    %44 = arith.mulf %39, %37 : vector<8x16xf32>
    %45 = arith.subf %43, %44 : vector<8x16xf32>
    %46 = arith.mulf %39, %35 : vector<8x16xf32>
    %47 = arith.mulf %38, %37 : vector<8x16xf32>
    %48 = arith.addf %46, %47 : vector<8x16xf32>
    %49 = arith.mulf %40, %35 : vector<8x16xf32>
    %50 = arith.mulf %41, %37 : vector<8x16xf32>
    %51 = arith.subf %49, %50 : vector<8x16xf32>
    %52 = arith.mulf %41, %35 : vector<8x16xf32>
    %53 = arith.mulf %40, %37 : vector<8x16xf32>
    %54 = arith.addf %52, %53 : vector<8x16xf32>
    %55 = vector.extract_strided_slice %45 {offsets = [0, 0], sizes = [8, 4], strides = [1, 1]} : vector<8x16xf32> to vector<8x4xf32>
    %56 = vector.extract_strided_slice %48 {offsets = [0, 0], sizes = [8, 4], strides = [1, 1]} : vector<8x16xf32> to vector<8x4xf32>
    %57 = tpu.concatenate %55, %56 in 1 : vector<8x4xf32>, vector<8x4xf32> -> vector<8x8xf32>
    %58 = arith.truncf %57 : vector<8x8xf32> to vector<8x8xbf16>
    %c0_19 = arith.constant 0 : index
    %c0_20 = arith.constant 0 : index
    %c0_21 = arith.constant 0 : index
    %c0_22 = arith.constant 0 : index
    %59 = vector.load %arg8[%c0_19, %c0_20, %c0_21, %c0_22] : memref<1x4x8x8xbf16, #tpu.memory_space<vmem>>, vector<1x1x8x8xbf16>
    %60 = vector.shape_cast %59 : vector<1x1x8x8xbf16> to vector<8x8xbf16>
    %61 = vector.shape_cast %58 : vector<8x8xbf16> to vector<1x1x8x8xbf16>
    tpu.vector_store %arg8[%c0_19, %c0_20, %c0_21, %c0_22], %61 {strides = array<i32>} : memref<1x4x8x8xbf16, #tpu.memory_space<vmem>>, vector<1x1x8x8xbf16>,
    %62 = vector.extract_strided_slice %51 {offsets = [0, 0], sizes = [8, 4], strides = [1, 1]} : vector<8x16xf32> to vector<8x4xf32>
    %63 = vector.extract_strided_slice %54 {offsets = [0, 0], sizes = [8, 4], strides = [1, 1]} : vector<8x16xf32> to vector<8x4xf32>
    %64 = tpu.concatenate %62, %63 in 1 : vector<8x4xf32>, vector<8x4xf32> -> vector<8x8xf32>
    %65 = arith.truncf %64 : vector<8x8xf32> to vector<8x8xbf16>
    %c0_23 = arith.constant 0 : index
    %c0_24 = arith.constant 0 : index
    %c0_25 = arith.constant 0 : index
    %c0_26 = arith.constant 0 : index
    %66 = vector.load %arg9[%c0_23, %c0_24, %c0_25, %c0_26] : memref<1x4x8x8xbf16, #tpu.memory_space<vmem>>, vector<1x1x8x8xbf16>
    %67 = vector.shape_cast %66 : vector<1x1x8x8xbf16> to vector<8x8xbf16>
    %68 = vector.shape_cast %65 : vector<8x8xbf16> to vector<1x1x8x8xbf16>
    tpu.vector_store %arg9[%c0_23, %c0_24, %c0_25, %c0_26], %68 {strides = array<i32>} : memref<1x4x8x8xbf16, #tpu.memory_space<vmem>>, vector<1x1x8x8xbf16>,
    %69 = vector.extract_strided_slice %42 {offsets = [0, 0], sizes = [8, 8], strides = [1, 1]} : vector<8x32xf32> to vector<8x8xf32>
    %70 = arith.truncf %69 : vector<8x8xf32> to vector<8x8xbf16>
    %c0_27 = arith.constant 0 : index
    %c0_28 = arith.constant 0 : index
    %c0_29 = arith.constant 0 : index
    %c0_30 = arith.constant 0 : index
    %71 = vector.load %arg10[%c0_27, %c0_28, %c0_29, %c0_30] : memref<1x4x8x8xbf16, #tpu.memory_space<vmem>>, vector<1x1x8x8xbf16>
    %72 = vector.shape_cast %71 : vector<1x1x8x8xbf16> to vector<8x8xbf16>
    %73 = vector.shape_cast %70 : vector<8x8xbf16> to vector<1x1x8x8xbf16>
    tpu.vector_store %arg10[%c0_27, %c0_28, %c0_29, %c0_30], %73 {strides = array<i32>} : memref<1x4x8x8xbf16, #tpu.memory_space<vmem>>, vector<1x1x8x8xbf16>,
    %74 = vector.extract_strided_slice %45 {offsets = [0, 4], sizes = [8, 4], strides = [1, 1]} : vector<8x16xf32> to vector<8x4xf32>
    %75 = vector.extract_strided_slice %48 {offsets = [0, 4], sizes = [8, 4], strides = [1, 1]} : vector<8x16xf32> to vector<8x4xf32>
    %76 = tpu.concatenate %74, %75 in 1 : vector<8x4xf32>, vector<8x4xf32> -> vector<8x8xf32>
    %77 = arith.truncf %76 : vector<8x8xf32> to vector<8x8xbf16>
    %c0_31 = arith.constant 0 : index
    %c1 = arith.constant 1 : index
    %c0_32 = arith.constant 0 : index
    %c0_33 = arith.constant 0 : index
    %78 = vector.load %arg8[%c0_31, %c1, %c0_32, %c0_33] : memref<1x4x8x8xbf16, #tpu.memory_space<vmem>>, vector<1x1x8x8xbf16>
    %79 = vector.shape_cast %78 : vector<1x1x8x8xbf16> to vector<8x8xbf16>
    %80 = vector.shape_cast %77 : vector<8x8xbf16> to vector<1x1x8x8xbf16>
    tpu.vector_store %arg8[%c0_31, %c1, %c0_32, %c0_33], %80 {strides = array<i32>} : memref<1x4x8x8xbf16, #tpu.memory_space<vmem>>, vector<1x1x8x8xbf16>,
    %81 = vector.extract_strided_slice %51 {offsets = [0, 4], sizes = [8, 4], strides = [1, 1]} : vector<8x16xf32> to vector<8x4xf32>
    %82 = vector.extract_strided_slice %54 {offsets = [0, 4], sizes = [8, 4], strides = [1, 1]} : vector<8x16xf32> to vector<8x4xf32>
    %83 = tpu.concatenate %81, %82 in 1 : vector<8x4xf32>, vector<8x4xf32> -> vector<8x8xf32>
    %84 = arith.truncf %83 : vector<8x8xf32> to vector<8x8xbf16>
    %c0_34 = arith.constant 0 : index
    %c1_35 = arith.constant 1 : index
    %c0_36 = arith.constant 0 : index
    %c0_37 = arith.constant 0 : index
    %85 = vector.load %arg9[%c0_34, %c1_35, %c0_36, %c0_37] : memref<1x4x8x8xbf16, #tpu.memory_space<vmem>>, vector<1x1x8x8xbf16>
    %86 = vector.shape_cast %85 : vector<1x1x8x8xbf16> to vector<8x8xbf16>
    %87 = vector.shape_cast %84 : vector<8x8xbf16> to vector<1x1x8x8xbf16>
    tpu.vector_store %arg9[%c0_34, %c1_35, %c0_36, %c0_37], %87 {strides = array<i32>} : memref<1x4x8x8xbf16, #tpu.memory_space<vmem>>, vector<1x1x8x8xbf16>,
    %88 = vector.extract_strided_slice %42 {offsets = [0, 8], sizes = [8, 8], strides = [1, 1]} : vector<8x32xf32> to vector<8x8xf32>
    %89 = arith.truncf %88 : vector<8x8xf32> to vector<8x8xbf16>
    %c0_38 = arith.constant 0 : index
    %c1_39 = arith.constant 1 : index
    %c0_40 = arith.constant 0 : index
    %c0_41 = arith.constant 0 : index
    %90 = vector.load %arg10[%c0_38, %c1_39, %c0_40, %c0_41] : memref<1x4x8x8xbf16, #tpu.memory_space<vmem>>, vector<1x1x8x8xbf16>
    %91 = vector.shape_cast %90 : vector<1x1x8x8xbf16> to vector<8x8xbf16>
    %92 = vector.shape_cast %89 : vector<8x8xbf16> to vector<1x1x8x8xbf16>
    tpu.vector_store %arg10[%c0_38, %c1_39, %c0_40, %c0_41], %92 {strides = array<i32>} : memref<1x4x8x8xbf16, #tpu.memory_space<vmem>>, vector<1x1x8x8xbf16>,
    %93 = vector.extract_strided_slice %45 {offsets = [0, 8], sizes = [8, 4], strides = [1, 1]} : vector<8x16xf32> to vector<8x4xf32>
    %94 = vector.extract_strided_slice %48 {offsets = [0, 8], sizes = [8, 4], strides = [1, 1]} : vector<8x16xf32> to vector<8x4xf32>
    %95 = tpu.concatenate %93, %94 in 1 : vector<8x4xf32>, vector<8x4xf32> -> vector<8x8xf32>
    %96 = arith.truncf %95 : vector<8x8xf32> to vector<8x8xbf16>
    %c0_42 = arith.constant 0 : index
    %c2 = arith.constant 2 : index
    %c0_43 = arith.constant 0 : index
    %c0_44 = arith.constant 0 : index
    %97 = vector.load %arg8[%c0_42, %c2, %c0_43, %c0_44] : memref<1x4x8x8xbf16, #tpu.memory_space<vmem>>, vector<1x1x8x8xbf16>
    %98 = vector.shape_cast %97 : vector<1x1x8x8xbf16> to vector<8x8xbf16>
    %99 = vector.shape_cast %96 : vector<8x8xbf16> to vector<1x1x8x8xbf16>
    tpu.vector_store %arg8[%c0_42, %c2, %c0_43, %c0_44], %99 {strides = array<i32>} : memref<1x4x8x8xbf16, #tpu.memory_space<vmem>>, vector<1x1x8x8xbf16>,
    %100 = vector.extract_strided_slice %51 {offsets = [0, 8], sizes = [8, 4], strides = [1, 1]} : vector<8x16xf32> to vector<8x4xf32>
    %101 = vector.extract_strided_slice %54 {offsets = [0, 8], sizes = [8, 4], strides = [1, 1]} : vector<8x16xf32> to vector<8x4xf32>
    %102 = tpu.concatenate %100, %101 in 1 : vector<8x4xf32>, vector<8x4xf32> -> vector<8x8xf32>
    %103 = arith.truncf %102 : vector<8x8xf32> to vector<8x8xbf16>
    %c0_45 = arith.constant 0 : index
    %c2_46 = arith.constant 2 : index
    %c0_47 = arith.constant 0 : index
    %c0_48 = arith.constant 0 : index
    %104 = vector.load %arg9[%c0_45, %c2_46, %c0_47, %c0_48] : memref<1x4x8x8xbf16, #tpu.memory_space<vmem>>, vector<1x1x8x8xbf16>
    %105 = vector.shape_cast %104 : vector<1x1x8x8xbf16> to vector<8x8xbf16>
    %106 = vector.shape_cast %103 : vector<8x8xbf16> to vector<1x1x8x8xbf16>
    tpu.vector_store %arg9[%c0_45, %c2_46, %c0_47, %c0_48], %106 {strides = array<i32>} : memref<1x4x8x8xbf16, #tpu.memory_space<vmem>>, vector<1x1x8x8xbf16>,
    %107 = vector.extract_strided_slice %42 {offsets = [0, 16], sizes = [8, 8], strides = [1, 1]} : vector<8x32xf32> to vector<8x8xf32>
    %108 = arith.truncf %107 : vector<8x8xf32> to vector<8x8xbf16>
    %c0_49 = arith.constant 0 : index
    %c2_50 = arith.constant 2 : index
    %c0_51 = arith.constant 0 : index
    %c0_52 = arith.constant 0 : index
    %109 = vector.load %arg10[%c0_49, %c2_50, %c0_51, %c0_52] : memref<1x4x8x8xbf16, #tpu.memory_space<vmem>>, vector<1x1x8x8xbf16>
    %110 = vector.shape_cast %109 : vector<1x1x8x8xbf16> to vector<8x8xbf16>
    %111 = vector.shape_cast %108 : vector<8x8xbf16> to vector<1x1x8x8xbf16>
    tpu.vector_store %arg10[%c0_49, %c2_50, %c0_51, %c0_52], %111 {strides = array<i32>} : memref<1x4x8x8xbf16, #tpu.memory_space<vmem>>, vector<1x1x8x8xbf16>,
    %112 = vector.extract_strided_slice %45 {offsets = [0, 12], sizes = [8, 4], strides = [1, 1]} : vector<8x16xf32> to vector<8x4xf32>
    %113 = vector.extract_strided_slice %48 {offsets = [0, 12], sizes = [8, 4], strides = [1, 1]} : vector<8x16xf32> to vector<8x4xf32>
    %114 = tpu.concatenate %112, %113 in 1 : vector<8x4xf32>, vector<8x4xf32> -> vector<8x8xf32>
    %115 = arith.truncf %114 : vector<8x8xf32> to vector<8x8xbf16>
    %c0_53 = arith.constant 0 : index
    %c3 = arith.constant 3 : index
    %c0_54 = arith.constant 0 : index
    %c0_55 = arith.constant 0 : index
    %116 = vector.load %arg8[%c0_53, %c3, %c0_54, %c0_55] : memref<1x4x8x8xbf16, #tpu.memory_space<vmem>>, vector<1x1x8x8xbf16>
    %117 = vector.shape_cast %116 : vector<1x1x8x8xbf16> to vector<8x8xbf16>
    %118 = vector.shape_cast %115 : vector<8x8xbf16> to vector<1x1x8x8xbf16>
    tpu.vector_store %arg8[%c0_53, %c3, %c0_54, %c0_55], %118 {strides = array<i32>} : memref<1x4x8x8xbf16, #tpu.memory_space<vmem>>, vector<1x1x8x8xbf16>,
    %119 = vector.extract_strided_slice %51 {offsets = [0, 12], sizes = [8, 4], strides = [1, 1]} : vector<8x16xf32> to vector<8x4xf32>
    %120 = vector.extract_strided_slice %54 {offsets = [0, 12], sizes = [8, 4], strides = [1, 1]} : vector<8x16xf32> to vector<8x4xf32>
    %121 = tpu.concatenate %119, %120 in 1 : vector<8x4xf32>, vector<8x4xf32> -> vector<8x8xf32>
    %122 = arith.truncf %121 : vector<8x8xf32> to vector<8x8xbf16>
    %c0_56 = arith.constant 0 : index
    %c3_57 = arith.constant 3 : index
    %c0_58 = arith.constant 0 : index
    %c0_59 = arith.constant 0 : index
    %123 = vector.load %arg9[%c0_56, %c3_57, %c0_58, %c0_59] : memref<1x4x8x8xbf16, #tpu.memory_space<vmem>>, vector<1x1x8x8xbf16>
    %124 = vector.shape_cast %123 : vector<1x1x8x8xbf16> to vector<8x8xbf16>
    %125 = vector.shape_cast %122 : vector<8x8xbf16> to vector<1x1x8x8xbf16>
    tpu.vector_store %arg9[%c0_56, %c3_57, %c0_58, %c0_59], %125 {strides = array<i32>} : memref<1x4x8x8xbf16, #tpu.memory_space<vmem>>, vector<1x1x8x8xbf16>,
    %126 = vector.extract_strided_slice %42 {offsets = [0, 24], sizes = [8, 8], strides = [1, 1]} : vector<8x32xf32> to vector<8x8xf32>
    %127 = arith.truncf %126 : vector<8x8xf32> to vector<8x8xbf16>
    %c0_60 = arith.constant 0 : index
    %c3_61 = arith.constant 3 : index
    %c0_62 = arith.constant 0 : index
    %c0_63 = arith.constant 0 : index
    %128 = vector.load %arg10[%c0_60, %c3_61, %c0_62, %c0_63] : memref<1x4x8x8xbf16, #tpu.memory_space<vmem>>, vector<1x1x8x8xbf16>
    %129 = vector.shape_cast %128 : vector<1x1x8x8xbf16> to vector<8x8xbf16>
    %130 = vector.shape_cast %127 : vector<8x8xbf16> to vector<1x1x8x8xbf16>
    tpu.vector_store %arg10[%c0_60, %c3_61, %c0_62, %c0_63], %130 {strides = array<i32>} : memref<1x4x8x8xbf16, #tpu.memory_space<vmem>>, vector<1x1x8x8xbf16>,
    return
  }
  func.func @transform_0(%arg0: i32, %arg1: i32) -> (i32, i32, i32) {
    %c0_i32 = arith.constant 0 : i32
    %c0_i32_0 = arith.constant 0 : i32
    return %arg0, %arg1, %c0_i32 : i32, i32, i32
  }
  func.func @transform_1(%arg0: i32, %arg1: i32) -> (i32, i32, i32) {
    %c0_i32 = arith.constant 0 : i32
    %c0_i32_0 = arith.constant 0 : i32
    return %arg0, %arg1, %c0_i32 : i32, i32, i32
  }
  func.func @transform_2(%arg0: i32, %arg1: i32) -> (i32, i32, i32) {
    %c0_i32 = arith.constant 0 : i32
    %c0_i32_0 = arith.constant 0 : i32
    return %arg0, %arg1, %c0_i32 : i32, i32, i32
  }
  func.func @transform_3(%arg0: i32, %arg1: i32) -> (i32, i32) {
    %c0_i32 = arith.constant 0 : i32
    %c0_i32_0 = arith.constant 0 : i32
    %c0_i32_1 = arith.constant 0 : i32
    return %c0_i32, %c0_i32_0 : i32, i32
  }
  func.func @transform_4(%arg0: i32, %arg1: i32) -> (i32, i32) {
    %c0_i32 = arith.constant 0 : i32
    %c0_i32_0 = arith.constant 0 : i32
    %c0_i32_1 = arith.constant 0 : i32
    return %c0_i32, %c0_i32_0 : i32, i32
  }
  func.func @transform_5(%arg0: i32, %arg1: i32) -> (i32, i32) {
    %c0_i32 = arith.constant 0 : i32
    %c0_i32_0 = arith.constant 0 : i32
    %c0_i32_1 = arith.constant 0 : i32
    return %c0_i32, %c0_i32_0 : i32, i32
  }
  func.func @transform_6(%arg0: i32, %arg1: i32) -> (i32, i32, i32, i32) {
    %c0_i32 = arith.constant 0 : i32
    %c0_i32_0 = arith.constant 0 : i32
    %c0_i32_1 = arith.constant 0 : i32
    return %arg0, %c0_i32, %arg1, %c0_i32_0 : i32, i32, i32, i32
  }
  func.func @transform_7(%arg0: i32, %arg1: i32) -> (i32, i32, i32, i32) {
    %c0_i32 = arith.constant 0 : i32
    %c0_i32_0 = arith.constant 0 : i32
    %c0_i32_1 = arith.constant 0 : i32
    return %arg0, %c0_i32, %arg1, %c0_i32_0 : i32, i32, i32, i32
  }
  func.func @transform_8(%arg0: i32, %arg1: i32) -> (i32, i32, i32, i32) {
    %c0_i32 = arith.constant 0 : i32
    %c0_i32_0 = arith.constant 0 : i32
    %c0_i32_1 = arith.constant 0 : i32
    return %arg0, %c0_i32, %arg1, %c0_i32_0 : i32, i32, i32, i32
  }
}

</mosaic_0001>

<bundles_post_ra>
// kernel: tpu_custom_call.1
= control target key start
LH: loop header
LB: loop body
LE: loop exit
PB: predicated region body
PF: predicated region fallthrough
CT: control target
= control target key end

     0   :  { %s1802_s0 = inlined_call_operand.hbm [shape: bf16[2,8,32], index: 0, kind: input, shape index: {}]   ;;  %s1803_s1 = inlined_call_operand.hbm [shape: f32[2,8,16], index: 1, kind: input, shape index: {}]   ;;  %s1804_s2 = inlined_call_operand.hbm [shape: f32[2,8,16], index: 2, kind: input, shape index: {}]   ;;  %s1805_s3 = inlined_call_operand.vmem [shape: f32[1,32], index: 3, kind: input, shape index: {}]   ;;  %s1806_s4 = inlined_call_operand.vmem [shape: f32[1,32], index: 4, kind: input, shape index: {}]   ;;  %s1807_s5 = inlined_call_operand.hbm [shape: bf16[32,96], index: 5, kind: input, shape index: {}]   ;;  %s1808_s6 = inlined_call_operand.hbm [shape: bf16[2,4,8,8], index: 6, kind: output, shape index: {0}]   ;;  %s1809_s7 = inlined_call_operand.hbm [shape: bf16[2,4,8,8], index: 7, kind: output, shape index: {1}]   ;;  %s1810_s8 = inlined_call_operand.hbm [shape: bf16[2,4,8,8], index: 8, kind: output, shape index: {2}]  }
   0x1   :  { %1822 = sst [smem:[#allocation26_spill]] %s1803_s1 }
   0x2   :  { %1823 = sst [smem:[#allocation27_spill]] %s1804_s2 }
   0x3   :  { %1824 = sst [smem:[#allocation28_spill]] %s1807_s5 }
   0x4   :  { %1825 = sst [smem:[#allocation29_spill]] %s1808_s6 }
   0x5   :  { %1826 = sst [smem:[#allocation30_spill]] %s1810_s8 }
   0x6   :  { %14 = vsyncpa [#allocation3], 0 }
   0x7   :  { %16 = vsyncpa [#allocation3 + $0x1], 0 }
   0x8   :  { %17 = vsyncpa [#allocation6], 0 }
   0x9   :  { %19 = vsyncpa [#allocation6 + $0x1], 0 }
   0xa   :  { %20 = vsyncpa [#allocation9], 0 }
   0xb   :  { %21 = vsyncpa [#allocation4], 0 }
   0xc   :  { %23 = vsyncpa [#allocation4 + $0x1], 0 }
   0xd   :  { %24 = vsyncpa [#allocation12], 0 }
   0xe   :  { %26 = vsyncpa [#allocation12 + $0x1], 0  ;;  %s1501_s27 = smov 0   ;;  %s1503_s28 = smov 0  }
   0xf   :  { %s1505_s29 = smov 0   ;;  %s1507_s30 = smov 0  }
  0x10   :  { %s1509_s9 = smov 0   ;;  %s1511_s10 = smov 0  }
  0x11 LB: > { %1827 = sst [smem:[#allocation19_spill]] %s1410_s27  ;;  %s1532_s11 = sadd.s32 4294967295, %s1430_s10   ;;  %s1430_s10 = sphi %s1511_s10, %s32_s10   ;;  %s1426_s9 = sphi %s1509_s9, %s1852_s9   ;;  %s1422_s30 = sphi %s1507_s30, %s1851_s30   ;;  %s1418_s29 = sphi %s1505_s29, %s1850_s29   ;;  %s1414_s28 = sphi %s1503_s28, %s1854_s28   ;;  %s1410_s27 = sphi %s1501_s27, %s1853_s27  }
  0x12   : > { %1828 = sst [smem:[#allocation20_spill]] %s1418_s29  ;;  %s1811_s12 = sadd.s32 4294967294, %s1430_s10  }
  0x13   : > { %1829 = sst [smem:[#allocation21_spill]] %s1426_s9  ;;  %s44_s13 = sadd.s32 1, %s1426_s9 }
  0x14   : > { %1830 = sst [smem:[#allocation22_spill]] %s1430_s10  ;;  %s53_s14 = sadd.s32 1, %s1418_s29 }
  0x15   : > { %p46_p0 = scmp.ge.s32.totalorder %s44_s13, 2  ;;  %p60_p1 = scmp.ne.s32.totalorder %s1418_s29, %s1414_s28 }
  0x16   : > { %p61_p2 = scmp.eq.s32.totalorder %s1430_s10, 0  ;;  %p66_p3 = scmp.ne.s32.totalorder %s1414_s28, %s1410_s27 }
  0x17   : > { %s1856_s13 = smov (%p46_p0, %s44_s13), 0  ;;  %p211_p5 = scmp.eq.s32.totalorder %s1532_s11, 1 }
  0x18   : > { %1831 = sst [smem:[#allocation23_spill]] %s1856_s13  ;;  %p62_p4 = por %p61_p2, %p60_p1 }
  0x19   : > { %s48_s15 = ssub.s32 %s1426_s9, %s1856_s13  ;;  %p217_p6 = scmp.eq.s32.totalorder %s1811_s12, 1 }
  0x1a   : > { %p51_p7 = scmp.eq.s32.totalorder %s48_s15, 0  ;;  %p1549_p8 = por %p211_p5, %p60_p1 }
  0x1b   : > { %p1556_p9 = por %p217_p6, %p66_p3  ;;  %p977_p10 = scmp.ge.s32.totalorder %s1430_s10, 2 }
  0x1c   : > { %s1561_s18 = scalar_select %p51_p7, %s1418_s29, %s53_s14  }
  0x1d   : > { %s1833_s17 = scalar_select %p1556_p9, 1, 0 }
  0x1e   : > { %1835 = sst [smem:[#allocation25_spill]] %s1561_s18  ;;  %p1067_p11 = scmp.lt.s32.totalorder %s1430_s10, 2 }
  0x1f   : > { %1834 = sst [smem:[#allocation24_spill]] %s1833_s17  ;;  %s1566_s19 = sand.u32 1, %s1418_s29  }
  0x20   : > { %s333_s20 = sand.u32 1, %s1430_s10   ;;  %p1569_p12 = pnand %p1067_p11, %p62_p4 }
  0x21   : > { %s1815_s22 = sshll.u32 %s1566_s19, 3  ;;  %s981_s23 = sshll.u32 %s1426_s9, 3 }
  0x22   : > { %s1837_s1 = sld [smem:[#allocation26_spill]]  ;;  %s337_s14 = scalar_lea.vmem [#allocation5], %s1815_s22 }
  0x23   : > { %s346_s15 = sshll.u32 %s337_s14, 4  ;;  %s1580_s13 = scalar_lea.sflag [#allocation6], %s333_s20  ;;  %s347_s15 = int_to_ptr.vmem [resolvable:$true] %s346_s15 }
  0x24   : > { %s1838_s2 = sld [smem:[#allocation27_spill]]  ;;  %p67_p13 = scmp.eq.s32.totalorder %s1532_s11, 0 }
  0x25   : > { %p975_p0 = scmp.ge.s32.totalorder %s1430_s10, 1  ;;  %p280_p1 = scmp.lt.s32.totalorder %s1430_s10, 3 }
  0x26   : > { %p1596_p2 = por %p67_p13, %p66_p3  ;;  %s1840_s5 = sld [smem:[#allocation28_spill]] }
  0x27   : > { %p1603_p4 = pnand %p975_p0, %p280_p1  ;;  %s1432_s29 = smov [#allocation8]  }
  0x28   : > { %s342_s26 = scalar_lea.hbm %s1837_s1, %s981_s23  ;;  %s978_s18 = sshll.u32 %s1566_s19, 2 }
  0x29   : > { %s344_s12 = sshll.u32 %s342_s26, 4  ;;  %p1042_p5 = pneg %p1603_p4  ;;  %s345_s12 = int_to_ptr.hbm [resolvable:$true] %s344_s12 }
  0x2a   : > { %1052 = dma.hbm_to_vmem [thread:$0]  (!%p1569_p12), %s345_s12, 128, %s347_s15, %s1580_s13  }
  0x2b   : > { %s362_s17 = scalar_lea.hbm %s1838_s2, %s981_s23  ;;  %s299_s12 = sshll.u32 %s1432_s29, 4  ;;  %s300_s12 = int_to_ptr.vmem [resolvable:$true] %s299_s12 }
  0x2c   : > { %s297_s26 = sshll.u32 %s1840_s5, 4  ;;  %p1043_p3 = pnand %p1042_p5, %p67_p13  ;;  %s298_s26 = int_to_ptr.hbm [resolvable:$true] %s297_s26 }
  0x2d   : > { %s979_s23 = sshll.u32 %s1426_s9, 2  ;;  %s1433_s15 = smov 64  }
  0x2e   : > { %s1434_s25 = smov 4   ;;  %s322_s1 = scalar_lea.hbm %s1802_s0, %s979_s23 }
  0x2f   : > { %1045 = dma.hbm_to_vmem [thread:$0]  (!%p1043_p3), %s298_s26, 256, %s300_s12, [#allocation9], %s1433_s15, %s1433_s15, %s1434_s25  }
  0x30   : > { %s317_s2 = scalar_lea.vmem [#allocation2], %s978_s18  ;;  %s324_s10 = sshll.u32 %s322_s1, 4  ;;  %s325_s10 = int_to_ptr.hbm [resolvable:$true] %s324_s10 }
  0x31   : > { %s326_s5 = sshll.u32 %s317_s2, 4  ;;  %s364_s29 = sshll.u32 %s362_s17, 4  ;;  %s327_s5 = int_to_ptr.vmem [resolvable:$true] %s326_s5  ;;  %s365_s29 = int_to_ptr.hbm [resolvable:$true] %s364_s29 }
  0x32   : > { %s314_s27 = scalar_lea.sflag [#allocation3], %s1566_s19  ;;  %s1842_s9 = sshll.u32 %s1566_s19, 3 }
  0x33   : > { %1049 = dma.hbm_to_vmem [thread:$0]  (!%p1569_p12), %s325_s10, 64, %s327_s5, %s314_s27  }
  0x34   : > { %s357_s8 = scalar_lea.vmem [#allocation7], %s1842_s9  ;;  %375 = sbr.rel (%p1603_p4) target bundleno = 767 (0x2ff), region = 44 }
  0x35   : > { %s366_s6 = sshll.u32 %s357_s8, 4  ;;  %s1627_s2 = sand.u32 (!%p1603_p4), 1, %s1414_s28   ;;  %s367_s6 = int_to_ptr.vmem [resolvable:$true] %s366_s6 }
  0x36   : > { %1055 = dma.hbm_to_vmem [thread:$0]  (!%p1569_p12), %s365_s29, 128, %s367_s6, %s1580_s13  }
  0x37   : > { %s985_s1 = sshll.u32 (!%p1603_p4), %s1627_s2, 2  ;;  %s378_s17 = scalar_lea.sflag (!%p1603_p4), [#allocation3], %s1627_s2 }
  0x38   : > { %s381_s22 = scalar_lea.vmem (!%p1603_p4), [#allocation2], %s985_s1 }
  0x39   : > { %1389 = dma.done.wait (%p1596_p2), %s378_s17, 64  }
  0x3a   : > { %1391 = vsyncadd (%p1596_p2), %s378_s17, 4294967232  ;;  %s387_s5 = sand.u32 1, %s1532_s11   ;;  %s986_s6 = sshll.u32 %s1627_s2, 3 }
  0x3b   : > { %s388_s8 = scalar_lea.sflag [#allocation6], %s387_s5  ;;  %s1639_s27 = scalar_lea.vmem [#allocation5], %s986_s6 }
  0x3c   : > { %1393 = dma.done.wait (%p1596_p2), %s388_s8, 256  }
  0x3d   : > { %1395 = vsyncadd (%p1596_p2), %s388_s8, 4294967040  ;;  %s401_s9 = scalar_lea.vmem [#allocation7], %s986_s6 }
  0x3e   : > { %1397 = dma.done.wait (%p67_p13), [#allocation9], 256  }
  0x3f   : > { %1399 = vsyncadd (%p67_p13), [#allocation9], 4294967040  ;;  %vm465_vm0 = vcmask 261120   ;;  %v461_v0 = vld [vmem:[%s381_s22] sm:$0xf]  ;;  %v1435_v3 = vmov 32.0  }
  0x40   : > { %v462_v1 = vunpack.c.l.bf16 %v461_v0  ;;  %1154 = vrcp.f32 %v1435_v3  ;;  %v1022_v15 = vld [vmem:[#allocation8 + $0x8] sm:$0xff]  ;;  %v553_v16 = vld [vmem:[%s401_s9] sm:$0xff]  ;;  %s1436_s10 = smov 48   ;;  %s1437_s13 = smov 16   ;;  %v1021_v17 = vld [vmem:[#allocation8] sm:$0xff]  ;;  %vm609_vm8 = vcmask 60416  }
  0x41   : > { %580 = vrot.lane.b32.xlu1 %v553_v16, %s1436_s10  ;;  %556 = vrot.lane.b32.xlu2 %v553_v16, %s1437_s13  ;;  %s1438_s19 = smov 32   ;;  %v552_v26 = vld [vmem:[%s1639_s27] sm:$0xff]  ;;  %v1152_v41 = vld [vmem:[%s1805_s3] ss:$0 sm:$0xff]  ;;  %s1439_s12 = smov 112   ;;  %vm606_vm9 = vcmask 31744  }
  0x42   : > { %v466_v2 = vsel %vm465_vm0, %v462_v1, 0.0  ;;  %545 = vmatpush.bf16.msra.mxu0 %v1022_v15  ;;  %v1153_v44 = vld [vmem:[%s1806_s4] ss:$0 sm:$0xff]  ;;  %s1440_s18 = smov 64   ;;  %s1441_s23 = smov 96  }
  0x43   : > { %467 = vadd.xlane.f32.xlu0 %v466_v2  ;;  %s1442_s15 = smov 124   ;;  %s1669_s25 = sshll.u32 %s1627_s2, 4 }
  0x44   : > { %s1672_s20 = scalar_lea.vmem [#allocation13], %s1669_s25  ;;  %s1443_s29 = smov 88  }
  0x45   : > { %s1444_s1 = smov 84   ;;  %s1445_s17 = smov 116  }
  0x46   : > { %v1155_v4 = vpop.eup %1154  ;;  %546 = vmatpush.bf16.msra.mxu0 %v1021_v17  ;;  %s1446_s22 = smov 92   ;;  %s1447_s6 = smov 104  }
  0x47   : > { %v470_v5 = vmul.f32 32.0, %v1155_v4  ;;  %vm474_vm1 = vweird.f32 %v1155_v4  ;;  %s1448_s8 = smov 80   ;;  %s1449_s27 = smov 76  }
  0x48   : > { %s1450_s9 = smov 40   ;;  %s1453_s21 = smov 108  }
  0x49   : > { %v471_v6 = vsub.f32 1.0, %v470_v5  ;;  %593 = vrot.lane.b32.xlu1 %v553_v16, %s1438_s19  ;;  %576 = vrot.lane.b32.xlu2 %v552_v26, %s1438_s19  ;;  %s1452_s19 = smov 120   ;;  %s1454_s24 = smov 56  }
  0x4a   : > { %s1680_s26 = scalar_lea.vmem [#allocation10], %s1669_s25  ;;  %s1692_s14 = sshll.u32 %s1422_s30, 4 }
  0x4b   : > { %v472_v7 = vmul.f32 %v1155_v4, %v471_v6 }
  0x4d   : > { %v473_v8 = vadd.f32 %v1155_v4, %v472_v7 }
  0x4f   : > { %v475_v9 = vsel %vm474_vm1, %v1155_v4, %v473_v8 }
  0x51   : > { %566 = vrot.lane.b32.xlu1 %v552_v26, %s1437_s13 }
  0x9b   : > { %v557_v53 = vpop.permute.xlu2 %556 }
  0xa3   : > { %v577_v58 = vpop.permute.xlu2 %576 }
  0xb3   : > { %v581_v48 = vpop.permute.xlu1 %580 }
  0xb6   : > { %v468_v10 = vpop.xlane.xlu0 %467 }
  0xb7   : > { %v476_v11 = vmul.f32 %v475_v9, %v468_v10 }
  0xb9   : > { %v477_v12 = vsub.f32 %v462_v1, %v476_v11 }
  0xbb   : > { %v478_v13 = vmul.f32 %v477_v12, %v477_v12  ;;  %v594_v49 = vpop.permute.xlu1 %593 }
  0xbd   : > { %v479_v14 = vsel %vm465_vm0, %v478_v13, 0.0 }
  0xbe   : > { %480 = vadd.xlane.f32.xlu0 %v479_v14 }
  0xc3   : > { %v567_v1 = vpop.permute.xlu1 %566 }
  0xd2   : > { %589 = vrot.lane.b32.xlu0 %v552_v26, %s1436_s10 }
 0x131   : > { %v481_v18 = vpop.xlane.xlu0 %480 }
 0x132   : > { %v482_v19 = vmul.f32 %v481_v18, %v475_v9 }
 0x134   : > { %v483_v20 = vadd.f32 1e-05, %v482_v19 }
 0x136   : > { %1156 = vrsqrt.f32 %v483_v20  ;;  %vm491_vm2 = vcmp.eq.f32.partialorder %v483_v20, inf  ;;  %v494_v29 = vand.u32 2147483648, %v483_v20  ;;  %vm493_vm3 = vcmp.eq.f32.partialorder %v483_v20, 0.0 }
 0x13c   : > { %v1157_v21 = vpop.eup %1156 }
 0x13d   : > { %v485_v22 = vmul.f32 %v1157_v21, %v483_v20 }
 0x13f   : > { %v486_v23 = vmul.f32 %v1157_v21, %v485_v22 }
 0x141   : > { %v487_v24 = vmul.f32 0.5, %v486_v23 }
 0x143   : > { %v488_v25 = vsub.f32 1.5, %v487_v24 }
 0x144   : > { %v590_v3 = vpop.permute.xlu0 %589 }
 0x145   : > { %v489_v27 = vmul.f32 %v1157_v21, %v488_v25 }
 0x147   : > { %v490_v28 = vmul.f32 %v489_v27, %v483_v20 }
 0x149   : > { %v492_v30 = vsel %vm491_vm2, %v483_v20, %v490_v28 }
 0x14a   : > { %v495_v31 = vsel %vm493_vm3, %v494_v29, %v492_v30 }
 0x14b   : > { %1158 = vrcp.f32 %v495_v31  ;;  %v507_v35 = vand.u32 2147483648, %v495_v31  ;;  %v505_v37 = vand.u32 2147483647, %v495_v31  ;;  %vm501_vm5 = vweird.f32 %v495_v31 }
 0x14d   : > { %v508_v39 = vor.u32 1.1754944e-38, %v507_v35  ;;  %vm506_vm7 = vcmp.eq.f32.partialorder %v505_v37, 8.507059e+37 }
 0x151   : > { %v1159_v32 = vpop.eup %1158 }
 0x152   : > { %v497_v33 = vmul.f32 %v1159_v32, %v495_v31  ;;  %vm502_vm4 = vweird.f32 %v1159_v32 }
 0x153   : > { %vm503_vm6 = vmor %vm501_vm5, %vm502_vm4 }
 0x154   : > { %v498_v34 = vsub.f32 1.0, %v497_v33 }
 0x156   : > { %v499_v36 = vmul.f32 %v1159_v32, %v498_v34 }
 0x158   : > { %v500_v38 = vadd.f32 %v1159_v32, %v499_v36 }
 0x15a   : > { %v504_v40 = vsel %vm503_vm6, %v1159_v32, %v500_v38 }
 0x15b   : > { %v509_v42 = vsel %vm506_vm7, %v508_v39, %v504_v40 }
 0x15c   : > { %v510_v43 = vmul.f32 %v509_v42, %v477_v12 }
 0x15e   : > { %v514_v45 = vmul.f32 %v1152_v41, %v510_v43 }
 0x160   : > { %v518_v46 = vadd.f32 %v1153_v44, %v514_v45 }
 0x162   : > { %v519_v47 = vpack.c.bf16 %v518_v46, %v518_v46 }
 0x164   : > { %1000 = vmatmul.msk.bf16.vlgmr.msra.gmra.mxu0 %vm465_vm0, %v519_v47 }
 0x1e1   : > { %v548_v50 = vpop.f32.mrf.mxu0 }
 0x1e2   : > { %v596_v51 = vmul.f32 %v594_v49, %v548_v50  ;;  %v583_v52 = vmul.f32 %v581_v48, %v548_v50  ;;  %v570_v55 = vmul.f32 %v553_v16, %v548_v50  ;;  %v559_v56 = vmul.f32 %v557_v53, %v548_v50 }
 0x1e3   : > { %v622_v57 = vpack.c.bf16 %v548_v50, %v548_v50  ;;  %v579_v59 = vmul.f32 %v577_v58, %v548_v50  ;;  %v554_v62 = vmul.f32 %v552_v26, %v548_v50  ;;  %v592_v4 = vmul.f32 %v590_v3, %v548_v50 }
 0x1e4   : > { %598 = vrot.lane.b32.xlu1 %v596_v51, %s1437_s13  ;;  %585 = vrot.lane.b32.xlu2 %v583_v52, %s1439_s12  ;;  %v569_v8 = vmul.f32 %v567_v1, %v548_v50 }
 0x1e9   : > { %v550_v54 = vpop.f32.mrf.mxu0 }
 0x1ec   : > { %572 = vrot.lane.b32.xlu1 %v570_v55, %s1437_s13  ;;  %561 = vrot.lane.b32.xlu2 %v559_v56, %s1439_s12  ;;  %s1451_s13 = smov 72  }
 0x1f4   : > { %624 = vrot.lane.b32.xlu2 %v622_v57, %s1440_s18 }
 0x23e   : > { %v586_v60 = vpop.permute.xlu2 %585 }
 0x23f   : > { %v588_v61 = vsub.f32 %v579_v59, %v586_v60 }
 0x241   : > { %612 = vrot.lane.b32.xlu0 %v588_v61, %s1441_s23 }
 0x246   : > { %v562_v63 = vpop.permute.xlu2 %561 }
 0x247   : > { %v564_v0 = vsub.f32 %v554_v62, %v562_v63 }
 0x249   : > { %629 = vrot.lane.b32.xlu0 %v564_v0, %s1442_s15  ;;  %s745_s15 = scalar_lea.hbm %s1809_s7, %s1692_s14 }
 0x24a   : > { %s1702_s30 = sshll.u32 %s745_s15, 4  ;;  %s749_s30 = int_to_ptr.hbm [resolvable:$true] %s1702_s30 }
 0x24e   : > { %v625_v2 = vpop.permute.xlu2 %624 }
 0x24f   : > { %627 = vst.msk [vmem:[%s1672_s20] sm:$0xf] %vm609_vm8, %v625_v2 }
 0x251   : > { %664 = vrot.lane.b32.xlu0 %v588_v61, %s1443_s29 }
 0x256   : > { %v599_v5 = vpop.permute.xlu1 %598 }
 0x257   : > { %v601_v6 = vadd.f32 %v599_v5, %v592_v4 }
 0x259   : > { %v1147_v7 = vpack.i.bf16 %v588_v61, %v601_v6 }
 0x25b   : > { %1148 = vrot.lane.b32.xlu1 %v1147_v7, %s1444_s1 }
 0x25e   : > { %v573_v9 = vpop.permute.xlu1 %572 }
 0x25f   : > { %v575_v10 = vadd.f32 %v573_v9, %v569_v8 }
 0x261   : > { %632 = vrot.lane.b32.xlu0 %v575_v10, %s1439_s12  ;;  %v1142_v11 = vpack.i.bf16 %v564_v0, %v575_v10 }
 0x263   : > { %1143 = vrot.lane.b32.xlu2 %v1142_v11, %s1445_s17  ;;  %639 = vrot.lane.b32.xlu1 %v588_v61, %s1446_s22  ;;  %s1843_s17 = sld [smem:[#allocation29_spill]] }
 0x269   : > { %682 = vrot.lane.b32.xlu0 %v575_v10, %s1447_s6  ;;  %s727_s22 = scalar_lea.hbm %s1843_s17, %s1692_s14  ;;  %s1717_s6 = scalar_lea.sflag [#allocation12], %s387_s5 }
 0x26b   : > { %642 = vrot.lane.b32.xlu2 %v601_v6, %s1448_s8  ;;  %667 = vrot.lane.b32.xlu1 %v601_v6, %s1449_s27  ;;  %s1294_s8 = sshra.s32 %s749_s30, 4  ;;  %s1295_s8 = int_to_ptr.hbm [resolvable:$true] %s1294_s8 }
 0x26c   : > { %s1296_s27 = scalar_lea.hbm %s1295_s8, 16  ;;  %p1301_p12 = scmp.lt.s32.totalorder %s1295_s8, %s1809_s7 }
 0x26d   : > { %p1297_p6 = scmp.ne.s32.totalorder %s1295_s8, %s1296_s27 }
 0x26f   : > { %p1298_p7 = pnand %p1297_p6, %p1549_p8 }
 0x271   : > { %699 = vrot.lane.b32.xlu0 %v622_v57, %s1450_s9  ;;  %p1299_p11 = pneg %p1298_p7 }
 0x273   : > { %692 = vrot.lane.b32.xlu2 %v601_v6, %s1451_s13  ;;  %654 = vrot.lane.b32.xlu1 %v564_v0, %s1452_s19  ;;  %s1300_s19 = scalar_lea.hbm %s1809_s7, 32 }
 0x274   : > { %p1302_p13 = scmp.lt.s32.totalorder %s1300_s19, %s1296_s27 }
 0x276   : > { %p1303_p0 = por %p1302_p13, %p1301_p12 }
 0x278   : > { %p1304_p1 = pnand %p1303_p0, %p1299_p11 }
 0x27b   : > { %657 = vrot.lane.b32.xlu2 %v575_v10, %s1453_s21  ;;  %649 = vrot.lane.b32.xlu1 %v622_v57, %s1454_s24 }
 0x283   : > { %674 = vrot.lane.b32.xlu2 %v622_v57, %s1436_s10  ;;  %s452_s10 = scalar_lea.vmem [#allocation11], %s1669_s25 }
 0x284   : > { %s746_s25 = sshll.u32 %s452_s10, 4  ;;  %s747_s25 = int_to_ptr.vmem [resolvable:$true] %s746_s25 }
 0x2b3   : > { %v613_v12 = vpop.permute.xlu0 %612 }
 0x2bb   : > { %v630_v16 = vpop.permute.xlu0 %629 }
 0x2bd   : > { %v1144_v13 = vpop.permute.xlu2 %1143 }
 0x2be   : > { %v1145_v14 = vunpack.i.l.bf16 %v1144_v13  ;;  %v1146_v35 = vunpack.i.h.bf16 %v1144_v13 }
 0x2c0   : > { %v607_v15 = vsel %vm606_vm9, %v564_v0, %v1145_v14 }
 0x2c1   : > { %v608_v17 = vpack.c.bf16 %v607_v15, %v607_v15 }
 0x2c3   : > { %610 = vst.msk [vmem:[%s1680_s26] sm:$0xf] %vm609_vm8, %v608_v17  ;;  %v665_v19 = vpop.permute.xlu0 %664 }
 0x2c5   : > { %v643_v18 = vpop.permute.xlu2 %642 }
 0x2cd   : > { %v693_v20 = vpop.permute.xlu2 %692  ;;  %v1149_v21 = vpop.permute.xlu1 %1148 }
 0x2ce   : > { %v1151_v22 = vunpack.i.h.bf16 %v1149_v21  ;;  %v1150_v23 = vunpack.i.l.bf16 %v1149_v21 }
 0x2d0   : > { %v695_v24 = vsel %vm606_vm9, %v1151_v22, %v693_v20  ;;  %v619_v25 = vsel %vm606_vm9, %v613_v12, %v1150_v23 }
 0x2d1   : > { %v696_v26 = vpack.c.bf16 %v695_v24, %v695_v24  ;;  %v620_v27 = vpack.c.bf16 %v619_v25, %v619_v25 }
 0x2d3   : > { %1008 = vst.msk [vmem:[%s452_s10 + $0xc] sm:$0xf] %vm609_vm8, %v696_v26  ;;  %v633_v28 = vpop.permute.xlu0 %632 }
 0x2d4   : > { %621 = vst.msk [vmem:[%s452_s10] sm:$0xf] %vm609_vm8, %v620_v27  ;;  %v635_v29 = vsel %vm606_vm9, %v630_v16, %v633_v28 }
 0x2d5   : > { %v636_v30 = vpack.c.bf16 %v635_v29, %v635_v29  ;;  %v658_v31 = vpop.permute.xlu2 %657  ;;  %v640_v32 = vpop.permute.xlu1 %639 }
 0x2d6   : > { %v645_v33 = vsel %vm606_vm9, %v640_v32, %v643_v18 }
 0x2d7   : > { %1001 = vst.msk [vmem:[%s1680_s26 + $0x4] sm:$0xf] %vm609_vm8, %v636_v30  ;;  %v646_v34 = vpack.c.bf16 %v645_v33, %v645_v33 }
 0x2d9   : > { %1002 = vst.msk [vmem:[%s452_s10 + $0x4] sm:$0xf] %vm609_vm8, %v646_v34 }
 0x2db   : > { %v683_v36 = vpop.permute.xlu0 %682 }
 0x2dc   : > { %v685_v37 = vsel %vm606_vm9, %v1146_v35, %v683_v36 }
 0x2dd   : > { %v686_v38 = vpack.c.bf16 %v685_v37, %v685_v37  ;;  %v675_v39 = vpop.permute.xlu2 %674  ;;  %v668_v40 = vpop.permute.xlu1 %667 }
 0x2de   : > { %1006 = vst.msk [vmem:[%s1672_s20 + $0x8] sm:$0xf] %vm609_vm8, %v675_v39  ;;  %v670_v41 = vsel %vm606_vm9, %v665_v19, %v668_v40 }
 0x2df   : > { %1007 = vst.msk [vmem:[%s1680_s26 + $0xc] sm:$0xf] %vm609_vm8, %v686_v38  ;;  %v671_v42 = vpack.c.bf16 %v670_v41, %v670_v41 }
 0x2e1   : > { %1005 = vst.msk [vmem:[%s452_s10 + $0x8] sm:$0xf] %vm609_vm8, %v671_v42 }
 0x2e2   : > { %1307 = shalt.err (!%p1304_p1)
}
 0x2e3   : > { %s1455_s11 = smov 4   ;;  %s728_s5 = sshll.u32 %s1680_s26, 4  ;;  %v700_v43 = vpop.permute.xlu0 %699  ;;  %s729_s5 = int_to_ptr.vmem [resolvable:$true] %s728_s5 }
 0x2e4   : > { %1037 = dma.vmem_to_hbm [thread:$0]  (%p1549_p8), %s747_s25, 256, %s749_s30, %s1717_s6, %s1440_s18, %s1440_s18, %s1455_s11  }
 0x2e5   : > { %1009 = vst.msk [vmem:[%s1672_s20 + $0xc] sm:$0xf] %vm609_vm8, %v700_v43  ;;  %s730_s10 = sshll.u32 %s727_s22, 4  ;;  %v655_v44 = vpop.permute.xlu1 %654  ;;  %s1844_s15 = sld [smem:[#allocation30_spill]]  ;;  %s731_s10 = int_to_ptr.hbm [resolvable:$true] %s730_s10 }
 0x2e6   : > { %v660_v45 = vsel %vm606_vm9, %v655_v44, %v658_v31  ;;  %s764_s1 = sshll.u32 %s1672_s20, 4  ;;  %s705_s30 = scalar_lea.sflag [#allocation4], %s1627_s2  ;;  %s765_s1 = int_to_ptr.vmem [resolvable:$true] %s764_s1 }
 0x2e7   : > { %v661_v46 = vpack.c.bf16 %v660_v45, %v660_v45  ;;  %s1322_s8 = sshra.s32 %s731_s10, 4  ;;  %s1328_s13 = scalar_lea.hbm %s1843_s17, 32  ;;  %s1323_s8 = int_to_ptr.hbm [resolvable:$true] %s1322_s8 }
 0x2e8   : > { %s1324_s27 = scalar_lea.hbm %s1323_s8, 16  ;;  %p1329_p3 = scmp.lt.s32.totalorder %s1323_s8, %s1843_s17 }
 0x2e9   : > { %1004 = vst.msk [vmem:[%s1680_s26 + $0x8] sm:$0xf] %vm609_vm8, %v661_v46  ;;  %p1325_p2 = scmp.ne.s32.totalorder %s1323_s8, %s1324_s27  ;;  %p1330_p6 = scmp.lt.s32.totalorder %s1328_s13, %s1324_s27 }
 0x2eb   : > { %s763_s29 = scalar_lea.hbm %s1844_s15, %s1692_s14  ;;  %p1326_p4 = pnand %p1325_p2, %p1549_p8 }
 0x2ec   : > { %s1744_s25 = sshll.u32 %s763_s29, 4  ;;  %p1331_p7 = por %p1330_p6, %p1329_p3  ;;  %s767_s25 = int_to_ptr.hbm [resolvable:$true] %s1744_s25 }
 0x2ed   : > { %p1327_p5 = pneg %p1326_p4 }
 0x2ef   : > { %p1332_p11 = pnand %p1331_p7, %p1327_p5 }
 0x2f1   : > { %1335 = shalt.err (!%p1332_p11)
}
 0x2f2   : > { %1036 = dma.vmem_to_hbm [thread:$0]  (%p1549_p8), %s729_s5, 256, %s731_s10, %s705_s30, %s1440_s18, %s1440_s18, %s1455_s11   ;;  %v650_v47 = vpop.permute.xlu1 %649 }
 0x2f3   : > { %1003 = vst.msk [vmem:[%s1672_s20 + $0x4] sm:$0xf] %vm609_vm8, %v650_v47  ;;  %s1350_s2 = sshra.s32 %s767_s25, 4  ;;  %s1356_s12 = scalar_lea.hbm %s1844_s15, 32  ;;  %s1351_s2 = int_to_ptr.hbm [resolvable:$true] %s1350_s2 }
 0x2f4   : > { %s1352_s26 = scalar_lea.hbm %s1351_s2, 16  ;;  %p1357_p1 = scmp.lt.s32.totalorder %s1351_s2, %s1844_s15 }
 0x2f5   : > { %p1353_p12 = scmp.ne.s32.totalorder %s1351_s2, %s1352_s26  ;;  %p1358_p2 = scmp.lt.s32.totalorder %s1356_s12, %s1352_s26 }
 0x2f7   : > { %p1354_p13 = pnand %p1353_p12, %p1549_p8  ;;  %p1359_p4 = por %p1358_p2, %p1357_p1 }
 0x2f9   : > { %p1355_p0 = pneg %p1354_p13 }
 0x2fb   : > { %p1360_p5 = pnand %p1359_p4, %p1355_p0 }
 0x2fd   : > { %1363 = shalt.err (!%p1360_p5)
}
 0x2fe   : > { %1038 = dma.vmem_to_hbm [thread:$0]  (%p1549_p8), %s765_s1, 256, %s767_s25, %s1717_s6, %s1440_s18, %s1440_s18, %s1455_s11  }
 0x2ff PF: > { %s1845_s20 = sld [smem:[#allocation19_spill]]  ;;  %p1057_p3 = pnand %p977_p10, %p1556_p9 }
 0x300   : > { %s1847_s10 = sld [smem:[#allocation22_spill]] }
 0x301   : > { %p1058_p6 = pneg %p1057_p3 }
 0x305   : > { %s781_s30 = sand.u32 1, %s1845_s20  }
 0x306   : > { %s782_s8 = scalar_lea.sflag [#allocation4], %s781_s30 }
 0x307   : > { %1401 = dma.done.wait (%p1058_p6), %s782_s8, 256  }
 0x308   : > { %1403 = vsyncadd (%p1058_p6), %s782_s8, 4294967040  ;;  %s1848_s27 = sadd.s32 4294967294, %s1847_s10  }
 0x309   : > { %s791_s16 = sand.u32 1, %s1848_s27  }
 0x30a   : > { %s792_s22 = scalar_lea.sflag [#allocation12], %s791_s16 }
 0x30b   : > { %1405 = dma.done.wait (%p1058_p6), %s792_s22, 512  }
 0x30c   : > { %1407 = vsyncadd (%p1058_p6), %s792_s22, 4294966784  ;;  %s32_s10 = sadd.s32 1, %s1847_s10   ;;  %s1849_s18 = sld [smem:[#allocation20_spill]] }
 0x30d   : > { %p29_p8 = scmp.ge.s32.totalorder %s32_s10, 4   ;;  %s1850_s29 = sld [smem:[#allocation25_spill]] }
 0x30e   : > { %s1851_s30 = sld [smem:[#allocation21_spill]]  ;;  %s1853_s27 = smov %s1414_s28 }
 0x30f   : > { %s1852_s9 = sld [smem:[#allocation23_spill]]  ;;  %31 = sbr.rel (!%p29_p8) target bundleno = 17 (0x11), region = 158 }
 0x312   : > { %s1854_s28 = smov %s1849_s18 }
 0x314   :  { %808 = vsyncpa [#allocation3], 1 }
 0x315   :  { %810 = vsyncpa [#allocation3 + $0x1], 1 }
 0x316   :  { %811 = vsyncpa [#allocation6], 1 }
 0x317   :  { %813 = vsyncpa [#allocation6 + $0x1], 1 }
 0x318   :  { %814 = vsyncpa [#allocation9], 1 }
 0x319   :  { %815 = vsyncpa [#allocation4], 1 }
 0x31a   :  { %817 = vsyncpa [#allocation4 + $0x1], 1 }
 0x31b   :  { %818 = vsyncpa [#allocation12], 1 }
 0x31c   :  { %820 = vsyncpa [#allocation12 + $0x1], 1 }

</bundles_post_ra>
